<compile_context>
chip_gen: v7x
topology: tpu7x:2x2x1
jax: 0.10.0
libtpu: 0.0.40
codegen_flags: <defaults>
</compile_context>

<pallas_src>
import math

import jax
import jax.numpy as jnp
from jax.experimental import pallas as pl
from jax.experimental.pallas import tpu as pltpu


def wplus_mask_kernel(w1f_ref, w2f_ref, w1a_ref, w1b_ref, b1_ref,
                      w2_ref, b2_ref, w3_ref, o_ref, acc_ref):
    """Grid step k accumulates one K-slice of linear_1; the last step finishes the MLP."""
    k = pl.program_id(0)

    @pl.when(k == 0)
    def _():
        acc_ref[...] = jnp.zeros_like(acc_ref)

    # linear_1 partial sums: torch.cat is folded into two bf16 MXU dots on the split weight.
    a1 = w1f_ref[...].astype(jnp.bfloat16)
    a2 = w2f_ref[...].astype(jnp.bfloat16)
    acc_ref[...] += (
        jnp.dot(a1, w1a_ref[...], preferred_element_type=jnp.float32)
        + jnp.dot(a2, w1b_ref[...], preferred_element_type=jnp.float32))

    @pl.when(k == pl.num_programs(0) - 1)
    def _():
        h1 = jnp.maximum(acc_ref[...] + b1_ref[...], 0.0)                 # relu_1
        h2 = jnp.maximum(
            jnp.dot(h1.astype(jnp.bfloat16), w2_ref[...],
                    preferred_element_type=jnp.float32) + b2_ref[...],
            0.0)                                                          # relu_2
        y = jnp.dot(h2.astype(jnp.bfloat16), w3_ref[...],
                    preferred_element_type=jnp.float32)                   # linear_3 (no bias)
        o_ref[...] = (1.0 / (1.0 + jnp.exp(-y))).astype(o_ref.dtype)      # sigmoid


def _pick_block_k(ns, cap=2304):
    """Largest multiple-of-128 divisor of `ns` not exceeding `cap`; fallback: full `ns`."""
    best = None
    for cand in range(128, min(ns, cap) + 1, 128):
        if ns % cand == 0:
            best = cand
    return best if best is not None else ns


def _vmem_limit_bytes(B, S, NS, block_k):
    """Budget scoped VMEM from the block sizes (bf16 weights, f32 activations)."""
    f32, bf16 = 4, 2
    budget = 0
    budget += 2 * 2 * B * block_k * f32        # w1f, w2f activation K-tiles (double-buffered)
    budget += 2 * 2 * block_k * S * bf16       # W1a, W1b weight K-tiles (double-buffered)
    budget += 2 * 1 * S * f32                  # b1, b2 (single-buffered, resident)
    budget += S * S * bf16                     # W2 (single-buffered, resident)
    budget += S * NS * bf16                    # W3 (single-buffered, resident)
    budget += 2 * B * NS * f32                 # output block (conservatively double-buffered)
    budget += B * S * f32                      # f32 linear_1 accumulator scratch
    # Headroom for compiler-internal scratch; clamp to v7x's 64 MiB physical VMEM.
    return min(64 * 1024 * 1024, max(32 * 1024 * 1024, budget + 8 * 1024 * 1024))


def wplus_mask_forward(w1, w2, params, *, block_k=None):
    """w1, w2: [B, N, S] f32.  params: w1a/w1b [N*S, S] bf16, b1/b2 [1, S] f32,
    w2 [S, S] bf16, w3 [S, N*S] bf16.  Returns sigmoid(MLP(cat(w1, w2))) as [B, N, S] f32."""
    B, N, S = w1.shape
    NS = N * S
    # Flattening is a free layout op; no concat is materialized anywhere.
    w1f = w1.reshape(B, NS)
    w2f = w2.reshape(B, NS)

    if block_k is None:
        block_k = _pick_block_k(NS)
    assert NS % block_k == 0, (NS, block_k)
    assert block_k == NS or block_k % 128 == 0, block_k   # lane-aligned K tiles

    # Grid-invariant operands: single-buffer them; double buffering only wastes VMEM.
    resident = dict(pipeline_mode=pl.Buffered(1))

    grid_spec = pltpu.PrefetchScalarGridSpec(
        num_scalar_prefetch=0,
        grid=(NS // block_k,),
        in_specs=[
            pl.BlockSpec((B, block_k), lambda k: (0, k)),         # w1 flattened  [B, NS]
            pl.BlockSpec((B, block_k), lambda k: (0, k)),         # w2 flattened  [B, NS]
            pl.BlockSpec((block_k, S), lambda k: (k, 0)),         # W1a (w1 half of linear_1)
            pl.BlockSpec((block_k, S), lambda k: (k, 0)),         # W1b (w2 half of linear_1)
            pl.BlockSpec((1, S), lambda k: (0, 0), **resident),   # b1 (resident)
            pl.BlockSpec((S, S), lambda k: (0, 0), **resident),   # W2 (resident)
            pl.BlockSpec((1, S), lambda k: (0, 0), **resident),   # b2 (resident)
            pl.BlockSpec((S, NS), lambda k: (0, 0), **resident),  # W3 (resident)
        ],
        out_specs=pl.BlockSpec((B, NS), lambda k: (0, 0)),        # lane-dense [B, N*S]
        scratch_shapes=[pltpu.VMEM((B, S), jnp.float32)],         # f32 linear_1 accumulator
    )

    out_flat = pl.pallas_call(
        wplus_mask_kernel,
        out_shape=jax.ShapeDtypeStruct((B, NS), jnp.float32),
        grid_spec=grid_spec,
        compiler_params=pltpu.CompilerParams(
            dimension_semantics=("arbitrary",),                   # K is a reduction axis
            vmem_limit_bytes=_vmem_limit_bytes(B, S, NS, block_k)),
    )(w1f, w2f, params["w1a"], params["w1b"], params["b1"],
      params["w2"], params["b2"], params["w3"])

    # TODO(synk): v7x dual-TensorCore variant (split the K reduction and the layer-3 output
    # columns across cores via pl.core_map / VMEM_SHARED) is not implemented here.
    return out_flat.reshape(B, N, S)


def init_params(key, size, n_latent):
    """Mirror PyTorch Linear init (uniform +/- 1/sqrt(fan_in)); weights stored bf16."""
    S, NS = size, size * n_latent
    in1 = 2 * NS
    k1, k2, k3, k4, k5 = jax.random.split(key, 5)
    bnd1 = 1.0 / math.sqrt(in1)
    w1 = jax.random.uniform(k1, (in1, S), jnp.float32, -bnd1, bnd1)   # [in, out] pre-transposed
    b1 = jax.random.uniform(k2, (1, S), jnp.float32, -bnd1, bnd1)
    bnd2 = 1.0 / math.sqrt(S)
    w2 = jax.random.uniform(k3, (S, S), jnp.float32, -bnd2, bnd2)
    b2 = jax.random.uniform(k4, (1, S), jnp.float32, -bnd2, bnd2)
    w3 = jax.random.uniform(k5, (S, NS), jnp.float32, -bnd2, bnd2)    # linear_3, no bias
    # bf16 weights halve HBM traffic (the kernel is bandwidth-bound at full size);
    # f32 biases + f32 accumulation keep the reductions accurate.
    # TODO(synk): int8 (v5e/v6e) / fp8 (v7x) quantization of W1a/W1b would shrink the dominant
    # layer-1 weight stream further but changes numerics; left out.
    return {"w1a": w1[:NS].astype(jnp.bfloat16), "w1b": w1[NS:].astype(jnp.bfloat16),
            "b1": b1, "w2": w2.astype(jnp.bfloat16), "b2": b2,
            "w3": w3.astype(jnp.bfloat16)}


def reference_forward(w1, w2, params):
    """Pure-JAX reference using the same bf16-weight / f32-accumulate math."""
    B, N, S = w1.shape
    z1 = w1.reshape(B, -1).astype(jnp.bfloat16)
    z2 = w2.reshape(B, -1).astype(jnp.bfloat16)
    h1 = jax.nn.relu(
        jnp.dot(z1, params["w1a"], preferred_element_type=jnp.float32)
        + jnp.dot(z2, params["w1b"], preferred_element_type=jnp.float32)
        + params["b1"])
    h2 = jax.nn.relu(
        jnp.dot(h1.astype(jnp.bfloat16), params["w2"],
                preferred_element_type=jnp.float32) + params["b2"])
    y = jnp.dot(h2.astype(jnp.bfloat16), params["w3"],
                preferred_element_type=jnp.float32)
    return jax.nn.sigmoid(y).reshape(B, N, S)


if __name__ == "__main__":
    # Small shapes consistent with the module (real model: size=512, n_latent=18, depth=3).
    # B=8 per the perf review: fills the 8-sublane vregs and amortizes the weight stream.
    B, SIZE, N_LATENT = 8, 64, 4      # N*S = 256 -> 2 K-blocks of 128 (exercises the reduction)

    key = jax.random.PRNGKey(0)
    kw1, kw2, kp = jax.random.split(key, 3)
    w1 = jax.random.normal(kw1, (B, N_LATENT, SIZE), jnp.float32)
    w2 = jax.random.normal(kw2, (B, N_LATENT, SIZE), jnp.float32)
    params = init_params(kp, SIZE, N_LATENT)

    out = wplus_mask_forward(w1, w2, params, block_k=128)
    jax.block_until_ready(out)
    assert out.shape == (B, N_LATENT, SIZE)

    ref = reference_forward(w1, w2, params)
    max_err = float(jnp.max(jnp.abs(out - ref)))
    assert jnp.allclose(out, ref, rtol=1e-3, atol=1e-3), max_err
    print("KERNEL_OK")
</pallas_src>

<mosaic_0001>
module attributes {stable_mosaic.version = 11 : i64} {
  func.func @wplus_mask_kernel(%arg0: i32, %arg1: memref<8x128xf32, #tpu.memory_space<vmem>>, %arg2: memref<8x128xf32, #tpu.memory_space<vmem>>, %arg3: memref<128x64xbf16, #tpu.memory_space<vmem>>, %arg4: memref<128x64xbf16, #tpu.memory_space<vmem>>, %arg5: memref<1x64xf32, #tpu.memory_space<vmem>>, %arg6: memref<64x64xbf16, #tpu.memory_space<vmem>>, %arg7: memref<1x64xf32, #tpu.memory_space<vmem>>, %arg8: memref<64x256xbf16, #tpu.memory_space<vmem>>, %arg9: memref<8x256xf32, #tpu.memory_space<vmem>>, %arg10: memref<8x64xf32, #tpu.memory_space<vmem>>) attributes {dimension_semantics = [#tpu.dimension_semantics<arbitrary>], iteration_bounds = array<i64: 2>, scalar_prefetch = 0 : i64, scratch_operands = 1 : i64, tpu.core_type = #tpu.core_type<tc>, window_params = [{transform_indices = @transform_0, window_bounds = array<i64: 8, 128>}, {transform_indices = @transform_1, window_bounds = array<i64: 8, 128>}, {transform_indices = @transform_2, window_bounds = array<i64: 128, 64>}, {transform_indices = @transform_3, window_bounds = array<i64: 128, 64>}, {pipeline_mode = #tpu.pipeline_mode<synchronous>, transform_indices = @transform_4, window_bounds = array<i64: 1, 64>}, {pipeline_mode = #tpu.pipeline_mode<synchronous>, transform_indices = @transform_5, window_bounds = array<i64: 64, 64>}, {pipeline_mode = #tpu.pipeline_mode<synchronous>, transform_indices = @transform_6, window_bounds = array<i64: 1, 64>}, {pipeline_mode = #tpu.pipeline_mode<synchronous>, transform_indices = @transform_7, window_bounds = array<i64: 64, 256>}, {pipeline_mode = #tpu.pipeline_mode<synchronous>, transform_indices = @transform_8, window_bounds = array<i64: 8, 256>}]} {
    %c0_i32 = arith.constant 0 : i32
    %0 = arith.cmpi eq, %arg0, %c0_i32 : i32
    %1 = arith.extui %0 : i1 to i32
    %c0_i32_0 = arith.constant 0 : i32
    %2 = arith.cmpi ne, %1, %c0_i32_0 : i32
    scf.if %2 {
      %cst_14 = arith.constant 0.000000e+00 : f32
      %18 = vector.broadcast %cst_14 : f32 to vector<8x64xf32>
      %c0_15 = arith.constant 0 : index
      %c0_16 = arith.constant 0 : index
      %19 = vector.load %arg10[%c0_15, %c0_16] : memref<8x64xf32, #tpu.memory_space<vmem>>, vector<8x64xf32>
      tpu.vector_store %arg10[%c0_15, %c0_16], %18 {strides = array<i32>} : memref<8x64xf32, #tpu.memory_space<vmem>>, vector<8x64xf32>,
    } else {
    }
    %c0 = arith.constant 0 : index
    %c0_1 = arith.constant 0 : index
    %3 = vector.load %arg1[%c0, %c0_1] : memref<8x128xf32, #tpu.memory_space<vmem>>, vector<8x128xf32>
    %4 = arith.truncf %3 : vector<8x128xf32> to vector<8x128xbf16>
    %c0_2 = arith.constant 0 : index
    %c0_3 = arith.constant 0 : index
    %5 = vector.load %arg2[%c0_2, %c0_3] : memref<8x128xf32, #tpu.memory_space<vmem>>, vector<8x128xf32>
    %6 = arith.truncf %5 : vector<8x128xf32> to vector<8x128xbf16>
    %c0_4 = arith.constant 0 : index
    %c0_5 = arith.constant 0 : index
    %7 = vector.load %arg10[%c0_4, %c0_5] : memref<8x64xf32, #tpu.memory_space<vmem>>, vector<8x64xf32>
    %c0_6 = arith.constant 0 : index
    %c0_7 = arith.constant 0 : index
    %8 = vector.load %arg3[%c0_6, %c0_7] : memref<128x64xbf16, #tpu.memory_space<vmem>>, vector<128x64xbf16>
    %cst = arith.constant dense<0.000000e+00> : vector<8x64xf32>
    %9 = tpu.matmul %4, %8, %cst {dimension_numbers = #tpu.dot_dimension_numbers<[1], [0], [0], [1], [0, 0, 1, 1], [], []>} : vector<8x128xbf16>, vector<128x64xbf16>, vector<8x64xf32> -> vector<8x64xf32>
    %c0_8 = arith.constant 0 : index
    %c0_9 = arith.constant 0 : index
    %10 = vector.load %arg4[%c0_8, %c0_9] : memref<128x64xbf16, #tpu.memory_space<vmem>>, vector<128x64xbf16>
    %cst_10 = arith.constant dense<0.000000e+00> : vector<8x64xf32>
    %11 = tpu.matmul %6, %10, %cst_10 {dimension_numbers = #tpu.dot_dimension_numbers<[1], [0], [0], [1], [0, 0, 1, 1], [], []>} : vector<8x128xbf16>, vector<128x64xbf16>, vector<8x64xf32> -> vector<8x64xf32>
    %12 = arith.addf %9, %11 : vector<8x64xf32>
    %13 = arith.addf %7, %12 : vector<8x64xf32>
    %c0_11 = arith.constant 0 : index
    %c0_12 = arith.constant 0 : index
    %14 = vector.load %arg10[%c0_11, %c0_12] : memref<8x64xf32, #tpu.memory_space<vmem>>, vector<8x64xf32>
    tpu.vector_store %arg10[%c0_11, %c0_12], %13 {strides = array<i32>} : memref<8x64xf32, #tpu.memory_space<vmem>>, vector<8x64xf32>,
    %c1_i32 = arith.constant 1 : i32
    %15 = arith.cmpi eq, %arg0, %c1_i32 : i32
    %16 = arith.extui %15 : i1 to i32
    %c0_i32_13 = arith.constant 0 : i32
    %17 = arith.cmpi ne, %16, %c0_i32_13 : i32
    scf.if %17 {
      %c0_14 = arith.constant 0 : index
      %c0_15 = arith.constant 0 : index
      %18 = vector.load %arg10[%c0_14, %c0_15] : memref<8x64xf32, #tpu.memory_space<vmem>>, vector<8x64xf32>
      %c0_16 = arith.constant 0 : index
      %c0_17 = arith.constant 0 : index
      %19 = vector.load %arg5[%c0_16, %c0_17] : memref<1x64xf32, #tpu.memory_space<vmem>>, vector<1x64xf32>
      %20 = vector.broadcast %19 : vector<1x64xf32> to vector<8x64xf32>
      %21 = arith.addf %18, %20 : vector<8x64xf32>
      %cst_18 = arith.constant 0.000000e+00 : f32
      %22 = vector.broadcast %cst_18 : f32 to vector<8x64xf32>
      %23 = arith.maximumf %21, %22 : vector<8x64xf32>
      %24 = arith.truncf %23 : vector<8x64xf32> to vector<8x64xbf16>
      %c0_19 = arith.constant 0 : index
      %c0_20 = arith.constant 0 : index
      %25 = vector.load %arg6[%c0_19, %c0_20] : memref<64x64xbf16, #tpu.memory_space<vmem>>, vector<64x64xbf16>
      %cst_21 = arith.constant dense<0.000000e+00> : vector<8x64xf32>
      %26 = tpu.matmul %24, %25, %cst_21 {dimension_numbers = #tpu.dot_dimension_numbers<[1], [0], [0], [1], [0, 0, 1, 1], [], []>} : vector<8x64xbf16>, vector<64x64xbf16>, vector<8x64xf32> -> vector<8x64xf32>
      %c0_22 = arith.constant 0 : index
      %c0_23 = arith.constant 0 : index
      %27 = vector.load %arg7[%c0_22, %c0_23] : memref<1x64xf32, #tpu.memory_space<vmem>>, vector<1x64xf32>
      %28 = vector.broadcast %27 : vector<1x64xf32> to vector<8x64xf32>
      %29 = arith.addf %26, %28 : vector<8x64xf32>
      %cst_24 = arith.constant 0.000000e+00 : f32
      %30 = vector.broadcast %cst_24 : f32 to vector<8x64xf32>
      %31 = arith.maximumf %29, %30 : vector<8x64xf32>
      %32 = arith.truncf %31 : vector<8x64xf32> to vector<8x64xbf16>
      %c0_25 = arith.constant 0 : index
      %c0_26 = arith.constant 0 : index
      %33 = vector.load %arg8[%c0_25, %c0_26] : memref<64x256xbf16, #tpu.memory_space<vmem>>, vector<64x256xbf16>
      %cst_27 = arith.constant dense<0.000000e+00> : vector<8x256xf32>
      %34 = tpu.matmul %32, %33, %cst_27 {dimension_numbers = #tpu.dot_dimension_numbers<[1], [0], [0], [1], [0, 0, 1, 1], [], []>} : vector<8x64xbf16>, vector<64x256xbf16>, vector<8x256xf32> -> vector<8x256xf32>
      %cst_28 = arith.constant 0.000000e+00 : f32
      %35 = vector.broadcast %cst_28 : f32 to vector<8x256xf32>
      %36 = arith.subf %35, %34 : vector<8x256xf32>
      %37 = math.exp %36 : vector<8x256xf32>
      %cst_29 = arith.constant 1.000000e+00 : f32
      %38 = vector.broadcast %cst_29 : f32 to vector<8x256xf32>
      %39 = arith.addf %38, %37 : vector<8x256xf32>
      %cst_30 = arith.constant 1.000000e+00 : f32
      %40 = vector.broadcast %cst_30 : f32 to vector<8x256xf32>
      %41 = arith.divf %40, %39 : vector<8x256xf32>
      %c0_31 = arith.constant 0 : index
      %c0_32 = arith.constant 0 : index
      %42 = vector.load %arg9[%c0_31, %c0_32] : memref<8x256xf32, #tpu.memory_space<vmem>>, vector<8x256xf32>
      tpu.vector_store %arg9[%c0_31, %c0_32], %41 {strides = array<i32>} : memref<8x256xf32, #tpu.memory_space<vmem>>, vector<8x256xf32>,
    } else {
    }
    return
  }
  func.func @transform_0(%arg0: i32) -> (i32, i32) {
    %c0_i32 = arith.constant 0 : i32
    %c0_i32_0 = arith.constant 0 : i32
    return %c0_i32, %arg0 : i32, i32
  }
  func.func @transform_1(%arg0: i32) -> (i32, i32) {
    %c0_i32 = arith.constant 0 : i32
    %c0_i32_0 = arith.constant 0 : i32
    return %c0_i32, %arg0 : i32, i32
  }
  func.func @transform_2(%arg0: i32) -> (i32, i32) {
    %c0_i32 = arith.constant 0 : i32
    %c0_i32_0 = arith.constant 0 : i32
    return %arg0, %c0_i32 : i32, i32
  }
  func.func @transform_3(%arg0: i32) -> (i32, i32) {
    %c0_i32 = arith.constant 0 : i32
    %c0_i32_0 = arith.constant 0 : i32
    return %arg0, %c0_i32 : i32, i32
  }
  func.func @transform_4(%arg0: i32) -> (i32, i32) {
    %c0_i32 = arith.constant 0 : i32
    %c0_i32_0 = arith.constant 0 : i32
    %c0_i32_1 = arith.constant 0 : i32
    return %c0_i32, %c0_i32_0 : i32, i32
  }
  func.func @transform_5(%arg0: i32) -> (i32, i32) {
    %c0_i32 = arith.constant 0 : i32
    %c0_i32_0 = arith.constant 0 : i32
    %c0_i32_1 = arith.constant 0 : i32
    return %c0_i32, %c0_i32_0 : i32, i32
  }
  func.func @transform_6(%arg0: i32) -> (i32, i32) {
    %c0_i32 = arith.constant 0 : i32
    %c0_i32_0 = arith.constant 0 : i32
    %c0_i32_1 = arith.constant 0 : i32
    return %c0_i32, %c0_i32_0 : i32, i32
  }
  func.func @transform_7(%arg0: i32) -> (i32, i32) {
    %c0_i32 = arith.constant 0 : i32
    %c0_i32_0 = arith.constant 0 : i32
    %c0_i32_1 = arith.constant 0 : i32
    return %c0_i32, %c0_i32_0 : i32, i32
  }
  func.func @transform_8(%arg0: i32) -> (i32, i32) {
    %c0_i32 = arith.constant 0 : i32
    %c0_i32_0 = arith.constant 0 : i32
    %c0_i32_1 = arith.constant 0 : i32
    return %c0_i32, %c0_i32_0 : i32, i32
  }
}

</mosaic_0001>

<bundles_post_ra>
// kernel: tpu_custom_call.1
= control target key start
LH: loop header
LB: loop body
LE: loop exit
PB: predicated region body
PF: predicated region fallthrough
CT: control target
= control target key end

     0   :  { %13 = vsyncpa [#allocation4], 0  ;;  %s1134_s27 = smov 0   ;;  %s1258_s0 = inlined_call_operand.vmem [shape: f32[8,256], index: 0, kind: input, shape index: {}]   ;;  %s1259_s1 = inlined_call_operand.vmem [shape: f32[8,256], index: 1, kind: input, shape index: {}]   ;;  %s1260_s2 = inlined_call_operand.vmem [shape: bf16[256,64], index: 2, kind: input, shape index: {}]   ;;  %s1261_s3 = inlined_call_operand.vmem [shape: bf16[256,64], index: 3, kind: input, shape index: {}]   ;;  %s1262_s4 = inlined_call_operand.vmem [shape: f32[1,64], index: 4, kind: input, shape index: {}]   ;;  %s1263_s5 = inlined_call_operand.vmem [shape: bf16[64,64], index: 5, kind: input, shape index: {}]   ;;  %s1264_s6 = inlined_call_operand.vmem [shape: f32[1,64], index: 6, kind: input, shape index: {}]   ;;  %s1265_s7 = inlined_call_operand.vmem [shape: bf16[64,256], index: 7, kind: input, shape index: {}]   ;;  %s1266_s8 = inlined_call_operand.hbm [shape: f32[8,256], index: 8, kind: output, shape index: {}]  }
   0x1 LB: > { %s1140_s28 = sadd.s32 4294967295, %s1080_s27   ;;  %p863_p0 = scmp.ge.s32.totalorder %s1080_s27, 1  ;;  %s1080_s27 = sphi %s1134_s27, %s19_s27  }
   0x2   : > { %p288_p1 = scmp.lt.s32.totalorder %s1080_s27, 3 }
   0x4   : > { %p289_p2 = pnand %p863_p0, %p288_p1 }
   0x5   : > { %p330_p3 = scmp.lt.s32.totalorder (!%p289_p2), %s1140_s28, 1  ;;  %s866_s29 = sshll.u32 (!%p289_p2), %s1140_s28, 4 }
   0x6   : > { %292 = sbr.rel (%p289_p2) target bundleno = 770 (0x302), region = 52  ;;  %p339_p4 = scmp.lt.s32.totalorder (!%p289_p2), %s866_s29, 31 }
   0x7   : > { %p870_p5 = scmp.ne.s32.totalorder (!%p289_p2), %s1140_s28, 0 }
   0xd   : > { %s331_s30 = scalar_select %p330_p3, %s1140_s28, 1 }
   0xe   : > { %s1268_s29 = smov (!%p339_p4, %s866_s29), 31  ;;  %354 = sbr.rel (%p870_p5) target bundleno = 21 (0x15), region = 56 }
   0xf   : > { %s864_s9 = sshll.u32 %s331_s30, 3  ;;  %s867_s16 = sshll.u32 %s1268_s29, 2  ;;  %vm355_vm0 = vcmask (!%p870_p5), 523264   ;;  %v1082_v0 = vmov (!%p870_p5), 0.0  }
  0x10   : > { %s1150_s12 = scalar_lea.vmem %s1258_s0, %s864_s9  ;;  %s1155_s15 = scalar_lea.vmem %s1259_s1, %s864_s9  ;;  %356 = vst.msk [vmem:[#allocation2] sm:$0xff] (!%p870_p5), %vm355_vm0, %v1082_v0 }
  0x11   : > { %s1160_s19 = scalar_lea.vmem %s1260_s2, %s867_s16  ;;  %s1165_s22 = scalar_lea.vmem %s1261_s3, %s867_s16 }
  0x15 PF: > { %v1004_v1 = vld [vmem:[%s1165_s22] sm:$0xff]   ;;  %v1083_v2 = vmov 0.0   ;;  %v1006_v4 = vld [vmem:[%s1165_s22 + $0x8] sm:$0xff]   ;;  %vm1084_vm1 = vmmov 0   ;;  %v1008_v6 = vld [vmem:[%s1165_s22 + $0x10] sm:$0xff]   ;;  %vm571_vm2 = vcmask 523264  }
  0x16   : > { %931 = vmatprep.subr.bf16.mxu0 %v1083_v2  ;;  %951 = vmatprep.subr.bf16.mxu1 %v1083_v2  ;;  %v1005_v3 = vld [vmem:[%s1160_s19] sm:$0xff]   ;;  %v1007_v5 = vld [vmem:[%s1160_s19 + $0x8] sm:$0xff]   ;;  %v1009_v7 = vld [vmem:[%s1160_s19 + $0x10] sm:$0xff]   ;;  %p887_p6 = scmp.ne.s32.totalorder %s1140_s28, 1 }
  0x17   : > { %932 = vmatpush3.bf16.msra.mxu0 %v1004_v1  ;;  %947 = vmatprep.mubr.msk.bf16.mxu0 %vm1084_vm1, %v1083_v2  ;;  %v1010_v8 = vld [vmem:[%s1165_s22 + $0x18] sm:$0xff]   ;;  %v1012_v10 = vld [vmem:[%s1165_s22 + $0x20] sm:$0xff]   ;;  %v1014_v12 = vld [vmem:[%s1165_s22 + $0x28] sm:$0xff]   ;;  %v1085_v34 = vmov (!%p887_p6), 0.0   ;;  %vm1086_vm3 = vmmov (!%p887_p6), 0   ;;  %v1087_v51 = vmov (!%p887_p6), 0  }
  0x18   : > { %952 = vmatpush3.bf16.msra.mxu1 %v1005_v3  ;;  %933 = vmatprep.subr.bf16.mxu0 %v1083_v2  ;;  %v1011_v9 = vld [vmem:[%s1160_s19 + $0x18] sm:$0xff]   ;;  %v1013_v11 = vld [vmem:[%s1160_s19 + $0x20] sm:$0xff]   ;;  %v1015_v13 = vld [vmem:[%s1160_s19 + $0x28] sm:$0xff]  }
  0x19   : > { %953 = vmatprep.subr.bf16.mxu1 %v1083_v2  ;;  %967 = vmatprep.mubr.msk.bf16.mxu1 %vm1084_vm1, %v1083_v2  ;;  %v1016_v14 = vld [vmem:[%s1165_s22 + $0x30] sm:$0xff]   ;;  %v1018_v16 = vld [vmem:[%s1165_s22 + $0x38] sm:$0xff]   ;;  %v359_v17 = vld [vmem:[%s1155_s15] sm:$0xff] }
  0x1a   : > { %v1017_v15 = vld [vmem:[%s1160_s19 + $0x30] sm:$0xff]   ;;  %v1019_v18 = vld [vmem:[%s1160_s19 + $0x38] sm:$0xff]   ;;  %v357_v19 = vld [vmem:[%s1150_s12] sm:$0xff]  ;;  %v360_v20 = vpack.c.bf16 %v359_v17, %v359_v17 }
  0x1b   : > { %934 = vmatpush3.bf16.msra.mxu0 %v1006_v4  ;;  %v358_v21 = vpack.c.bf16 %v357_v19, %v357_v19  ;;  %v361_v23 = vld [vmem:[#allocation2] sm:$0xff]  ;;  %v1021_v35 = vld [vmem:[%s1263_s5 + $0x8] sm:$0xff] (!%p887_p6)   ;;  %v1022_v36 = vld [vmem:[%s1263_s5 + $0x10] sm:$0xff] (!%p887_p6)  }
  0x1c   : > { %954 = vmatpush3.bf16.msra.mxu1 %v1007_v5  ;;  %935 = vmatprep.subr.bf16.mxu0 %v1083_v2  ;;  %v1020_v33 = vld [vmem:[%s1263_s5] sm:$0xff] (!%p887_p6)   ;;  %v1027_v42 = vld [vmem:[%s1265_s7 + $0x14] ss:$8 sps:$4 sm:$0xff] (!%p887_p6)   ;;  %v1029_v43 = vld [vmem:[%s1265_s7 + $0x10] ss:$8 sps:$4 sm:$0xff] (!%p887_p6)  }
  0x1d   : > { %955 = vmatprep.subr.bf16.mxu1 %v1083_v2  ;;  %v888_v38 = vld [vmem:[%s1262_s4] ss:$0 sm:$0xff] (!%p887_p6)  ;;  %v1024_v40 = vld [vmem:[%s1265_s7 + $0x4] ss:$8 sps:$4 sm:$0xff] (!%p887_p6)   ;;  %v1023_v46 = vld [vmem:[%s1263_s5 + $0x18] sm:$0xff] (!%p887_p6)  }
  0x1e   : > { %v1026_v41 = vld [vmem:[%s1265_s7] ss:$8 sps:$4 sm:$0xff] (!%p887_p6)   ;;  %v1030_v45 = vld [vmem:[%s1265_s7 + $0x24] ss:$8 sps:$4 sm:$0xff] (!%p887_p6)   ;;  %v1033_v49 = vld [vmem:[%s1265_s7 + $0x34] ss:$8 sps:$4 sm:$0xff] (!%p887_p6)  }
  0x1f   : > { %936 = vmatpush3.bf16.msra.mxu0 %v1008_v6  ;;  %v1032_v48 = vld [vmem:[%s1265_s7 + $0x20] ss:$8 sps:$4 sm:$0xff] (!%p887_p6)   ;;  %v1035_v50 = vld [vmem:[%s1265_s7 + $0x30] ss:$8 sps:$4 sm:$0xff] (!%p887_p6)  }
  0x20   : > { %956 = vmatpush3.bf16.msra.mxu1 %v1009_v7  ;;  %937 = vmatprep.subr.bf16.mxu0 %v1083_v2  ;;  %v889_v52 = vld [vmem:[%s1264_s6] ss:$0 sm:$0xff] (!%p887_p6) }
  0x21   : > { %957 = vmatprep.subr.bf16.mxu1 %v1083_v2 }
  0x23   : > { %938 = vmatpush3.bf16.msra.mxu0 %v1010_v8 }
  0x24   : > { %958 = vmatpush3.bf16.msra.mxu1 %v1011_v9  ;;  %939 = vmatprep.subr.bf16.mxu0 %v1083_v2 }
  0x25   : > { %959 = vmatprep.subr.bf16.mxu1 %v1083_v2 }
  0x27   : > { %940 = vmatpush3.bf16.msra.mxu0 %v1012_v10 }
  0x28   : > { %960 = vmatpush3.bf16.msra.mxu1 %v1013_v11  ;;  %941 = vmatprep.subr.bf16.mxu0 %v1083_v2 }
  0x29   : > { %961 = vmatprep.subr.bf16.mxu1 %v1083_v2 }
  0x2b   : > { %942 = vmatpush3.bf16.msra.mxu0 %v1014_v12 }
  0x2c   : > { %962 = vmatpush3.bf16.msra.mxu1 %v1015_v13  ;;  %943 = vmatprep.subr.bf16.mxu0 %v1083_v2 }
  0x2d   : > { %963 = vmatprep.subr.bf16.mxu1 %v1083_v2 }
  0x2f   : > { %944 = vmatpush3.bf16.msra.mxu0 %v1016_v14 }
  0x30   : > { %964 = vmatpush3.bf16.msra.mxu1 %v1017_v15  ;;  %945 = vmatprep.subr.bf16.mxu0 %v1083_v2 }
  0x31   : > { %965 = vmatprep.subr.bf16.mxu1 %v1083_v2 }
  0x33   : > { %946 = vmatpush3.bf16.msra.mxu0 %v1018_v16 }
  0x34   : > { %966 = vmatpush3.bf16.msra.mxu1 %v1019_v18  ;;  %971 = vmatprep.subr.bf16.mxu0 (!%p887_p6), %v1085_v34 }
  0x35   : > { %723 = vmatprep.subr.bf16.mxu1 (!%p887_p6), %v1024_v40 }
  0x36   : > { %948 = vmatmul.mubr.bf16.vlgmr.msra.gmra.mrb[0].mxu0 %v360_v20 }
  0x37   : > { %968 = vmatmul.mubr.bf16.vlgmr.msra.gmra.mrb[0].mxu1 %v358_v21  ;;  %972 = vmatpush3.bf16.msra.mxu0 (!%p887_p6), %v1020_v33 }
  0x38   : > { %979 = vmatprep.mubr.msk.bf16.mxu0 (!%p887_p6), %vm1086_vm3, %v1085_v34  ;;  %973 = vmatprep.subr.bf16.mxu0 (!%p887_p6), %v1085_v34 }
  0x39   : > { %724 = vmatpush1.bf16.msra.mxu1 (!%p887_p6), %v1026_v41  ;;  %755 = vmatprep.mubr.bf16.mxu1 (!%p887_p6), %v1087_v51 }
  0x3a   : > { %725 = vmatprep.subr.bf16.mxu1 (!%p887_p6), %v1027_v42 }
  0x3b   : > { %974 = vmatpush3.bf16.msra.mxu0 (!%p887_p6), %v1021_v35 }
  0x3c   : > { %975 = vmatprep.subr.bf16.mxu0 (!%p887_p6), %v1085_v34 }
  0x3d   : > { %726 = vmatpush1.bf16.msra.mxu1 (!%p887_p6), %v1029_v43 }
  0x3e   : > { %727 = vmatprep.subr.bf16.mxu1 (!%p887_p6), %v1030_v45 }
  0x3f   : > { %976 = vmatpush3.bf16.msra.mxu0 (!%p887_p6), %v1022_v36 }
  0x40   : > { %977 = vmatprep.subr.bf16.mxu0 (!%p887_p6), %v1085_v34 }
  0x41   : > { %728 = vmatpush1.bf16.msra.mxu1 (!%p887_p6), %v1032_v48 }
  0x42   : > { %729 = vmatprep.subr.bf16.mxu1 (!%p887_p6), %v1033_v49 }
  0x43   : > { %978 = vmatpush3.bf16.msra.mxu0 (!%p887_p6), %v1023_v46 }
  0x45   : > { %730 = vmatpush1.bf16.msra.mxu1 (!%p887_p6), %v1035_v50 }
 0x109   : > { %v476_v22 = vpop.f32.mrb[0].mxu0  ;;  %576 = sbr.rel (%p887_p6) target bundleno = 745 (0x2e9), region = 60 }
 0x10a   : > { %v564_v24 = vpop.f32.mrb[0].mxu1  ;;  %v949_v25 = vpop.f32.mrb[1].mxu0 }
 0x10b   : > { %v565_v26 = vadd.f32 %v564_v24, %v476_v22  ;;  %v969_v27 = vpop.f32.mrb[1].mxu1  ;;  %v479_v28 = vpop.f32.mrb[2].mxu0 }
 0x10c   : > { %v567_v29 = vpop.f32.mrb[2].mxu1  ;;  %v950_v30 = vpop.f32.mrb[3].mxu0 }
 0x10d   : > { %v570_v31 = vadd.f32 %v565_v26, %v361_v23  ;;  %v970_v32 = vpop.f32.mrb[3].mxu1 }
 0x10f   : > { %572 = vst.msk [vmem:[#allocation2] sm:$0xff] %vm571_vm2, %v570_v31 }
 0x116   : > { %v577_v37 = vld [vmem:[#allocation2] sm:$0xff] }
 0x117   : > { %v585_v39 = vadd.f32 %v888_v38, %v577_v37 }
 0x119   : > { %v586_v44 = vmax.f32 %v585_v39, 0.0 }
 0x11b   : > { %v587_v47 = vpack.c.bf16 %v586_v44, %v586_v44 }
 0x11d   : > { %980 = vmatmul.mubr.msk.bf16.vlgmr.msra.gmra.mrb[0].mxu0 %vm571_vm2, %v587_v47 }
 0x1f0   : > { %v664_v53 = vpop.f32.mrb[0].mxu0 }
 0x1f1   : > { %v665_v54 = vadd.f32 %v889_v52, %v664_v53  ;;  %v981_v55 = vpop.f32.mrb[1].mxu0 }
 0x1f2   : > { %v667_v56 = vpop.f32.mrb[2].mxu0 }
 0x1f3   : > { %v670_v57 = vmax.f32 %v665_v54, 0.0  ;;  %v982_v58 = vpop.f32.mrb[3].mxu0 }
 0x1f5   : > { %v671_v59 = vpack.c.bf16 %v670_v57, %v670_v57 }
 0x1f7   : > { %903 = vmatmul.mubr.msk.bf16.vlgmr.msra.gmra.mrb[0].mxu1 %vm571_vm2, %v671_v59 }
 0x2ca   : > { %v757_v60 = vpop.f32.mrb[0].mxu1 }
 0x2cb   : > { %v764_v61 = vsub.f32 0.0, %v757_v60  ;;  %v759_v62 = vpop.f32.mrb[1].mxu1 }
 0x2cc   : > { %v765_v63 = vsub.f32 0.0, %v759_v62  ;;  %v761_v0 = vpop.f32.mrb[2].mxu1 }
 0x2cd   : > { %v766_v1 = vmul.f32 1.442695, %v764_v61  ;;  %v762_v2 = vpop.f32.mrb[3].mxu1 }
 0x2ce   : > { %v768_v3 = vmul.f32 1.442695, %v765_v63 }
 0x2cf   : > { %1036 = vpow2.f32 %v766_v1 }
 0x2d0   : > { %1038 = vpow2.f32 %v768_v3 }
 0x2d9   : > { %v1037_v4 = vpop.eup %1036 }
 0x2da   : > { %v1039_v5 = vpop.eup %1038  ;;  %v770_v6 = vadd.f32 1.0, %v1037_v4 }
 0x2db   : > { %v771_v7 = vadd.f32 1.0, %v1039_v5 }
 0x2dc   : > { %1040 = vrcp.f32 %v770_v6 }
 0x2dd   : > { %1042 = vrcp.f32 %v771_v7 }
 0x2e6   : > { %v1041_v8 = vpop.eup %1040 }
 0x2e7   : > { %v1043_v9 = vpop.eup %1042  ;;  %776 = vst [vmem:[#allocation3] sm:$0xff] %v1041_v8 }
 0x2e8   : > { %777 = vst [vmem:[#allocation3 + $0x8] sm:$0xff] %v1043_v9 }
 0x2e9 PF: > { %p987_p7 = scmp.eq.s32.totalorder %s1140_s28, 1  ;;  %s1088_s11 = smov [#allocation3]  }
 0x2ea   : > { %s785_s12 = sshll.u32 %s1088_s11, 4  ;;  %s786_s12 = int_to_ptr.vmem [resolvable:$true] %s785_s12 }
 0x2eb   : > { %s1044_s13 = scalar_lea.vmem %s786_s12, 256  ;;  %p1051_p11 = scmp.lt.s32.totalorder %s786_s12, %s786_s12 }
 0x2ec   : > { %p1045_p8 = scmp.ne.s32.totalorder %s786_s12, %s1044_s13  ;;  %p1052_p12 = scmp.lt.s32.totalorder %s1044_s13, %s1044_s13 }
 0x2ee   : > { %p1046_p9 = pnand %p1045_p8, %p987_p7  ;;  %p1053_p13 = por %p1052_p12, %p1051_p11 }
 0x2f0   : > { %p1047_p10 = pneg %p1046_p9 }
 0x2f2   : > { %p1054_p0 = pnand %p1053_p13, %p1047_p10 }
 0x2f4   : > { %1057 = shalt.err (!%p1054_p0)
}
 0x2f5   : > { %s1058_s16 = scalar_lea.hbm %s1266_s8, 256 }
 0x2f6   : > { %p1059_p1 = scmp.ne.s32.totalorder %s1266_s8, %s1058_s16  ;;  %p1064_p4 = scmp.lt.u32.totalorder %s1058_s16, %s1266_s8 }
 0x2f8   : > { %p1060_p2 = pnand %p1059_p1, %p987_p7 }
 0x2fa   : > { %p1061_p3 = pneg %p1060_p2 }
 0x2fc   : > { %p1066_p5 = pnand %p1064_p4, %p1061_p3 }
 0x2fe   : > { %1069 = shalt.err (!%p1066_p5)
}
 0x2ff   : > { %984 = dma.vmem_to_hbm [thread:$0]  (%p987_p7), %s786_s12, 256, %s1266_s8, [#allocation4]  }
 0x300   : > { %1075 = dma.done.wait (%p987_p7), [#allocation4], 256  }
 0x301   : > { %1077 = vsyncadd (%p987_p7), [#allocation4], 4294967040 }
 0x302 PF: > { %s19_s27 = sadd.s32 1, %s1080_s27  }
 0x303   : > { %p16_p6 = scmp.ge.s32.totalorder %s19_s27, 4  }
 0x305   :  { %18 = sbr.rel (!%p16_p6) target bundleno = 1 (0x1), region = 96 }
 0x30c   :  { %798 = vsyncpa [#allocation4], 1 }
 0x30d   :  { %800 = vsyncpa [#allocation4 + $0x1], 1 }

</bundles_post_ra>
